<compile_context>
chip_gen: v5e
topology: v5e:2x2
jax: 0.10.0
libtpu: 0.0.40
codegen_flags: <defaults>
</compile_context>

<pallas_src>
import jax
import jax.numpy as jnp
from jax.experimental import pallas as pl
from jax.experimental.pallas import tpu as pltpu


# ----------------------------------------------------------------------------- kernels
def _logical_and_bool_kernel(a_ref, b_ref, o_ref):
    # torch.logical_and: True iff both operands are nonzero.
    o_ref[...] = jnp.logical_and(a_ref[...] != 0, b_ref[...] != 0)


def _logical_and_i8_kernel(a_ref, b_ref, o_ref):
    o_ref[...] = jnp.logical_and(a_ref[...] != 0, b_ref[...] != 0).astype(jnp.int8)


# -------------------------------------------------------------- bool-output capability
_BOOL_OUT_OK = None


def _bool_out_supported():
    """One-time probe: can this Mosaic version store jnp.bool_ to VMEM?"""
    global _BOOL_OUT_OK
    if _BOOL_OUT_OK is None:
        try:
            def _probe(a_ref, o_ref):
                o_ref[...] = a_ref[...] != 0

            out = pl.pallas_call(
                _probe,
                out_shape=jax.ShapeDtypeStruct((8, 128), jnp.bool_),
            )(jnp.ones((8, 128), jnp.float32))
            jax.block_until_ready(out)
            _BOOL_OUT_OK = True
        except Exception:
            _BOOL_OUT_OK = False
    return _BOOL_OUT_OK


# ----------------------------------------------------------------------- shape helpers
_LANE = 128
_MAX_COLS = 16384                 # lane-dense slab width cap
_SINGLE_BLOCK_BYTES = 2 << 20     # per-input size below which we skip the grid entirely
_TARGET_BLOCK_BYTES = 4 << 20     # per-input bytes per grid step (amortizes step cost)
_ROW_ALIGN = 32                   # int8/bool output native tile is (32, 128)


def _round_up(x, m):
    return (x + m - 1) // m * m


def _choose_cols(n):
    """Widest power-of-two multiple of 128 that is <= n (capped), for lane-dense stores."""
    cols = _LANE
    while cols * 2 <= _MAX_COLS and n >= cols * 2:
        cols *= 2
    return cols


def _pick_block_rows(rows, bytes_per_row):
    """Rows per grid step: multiple of 32, ~4 MiB of input, >= 2 grid steps, and an
    exact divisor of `rows` when one exists (no ragged last block)."""
    want = max(_ROW_ALIGN,
               (_TARGET_BLOCK_BYTES // bytes_per_row) // _ROW_ALIGN * _ROW_ALIGN)
    # Guarantee >= 2 grid steps so ("parallel",) shards across v7x's two TensorCores.
    want = min(want, _round_up(pl.cdiv(rows, 2), _ROW_ALIGN))
    if rows % want == 0:
        return want
    for cand in range(want - _ROW_ALIGN, 0, -_ROW_ALIGN):
        if rows % cand == 0:
            return cand
    # No aligned exact divisor: accept a ragged final block (masked stores only there);
    # padding the rows would cost a full extra copy pass of both inputs, which is worse.
    return want


# -------------------------------------------------------------------------------- impl
def _logical_and_impl(x, y):
    assert x.shape == y.shape, "elementwise logical_and requires equal shapes here"
    orig_shape = x.shape
    n = x.size
    if n == 0:
        return jnp.zeros(orig_shape, jnp.bool_)

    if _bool_out_supported():
        out_dtype, kernel = jnp.bool_, _logical_and_bool_kernel
    else:
        out_dtype, kernel = jnp.int8, _logical_and_i8_kernel

    itemsize = max(x.dtype.itemsize, y.dtype.itemsize)
    cols = _choose_cols(n)
    rows = pl.cdiv(n, cols)
    bytes_per_row = cols * itemsize

    use_grid = rows * bytes_per_row > _SINGLE_BLOCK_BYTES
    block_rows = rows
    if use_grid:
        block_rows = _pick_block_rows(rows, bytes_per_row)
        if block_rows >= rows:
            # Rare edge (e.g. very wide rows): a single resident block still fits VMEM.
            use_grid = False
            block_rows = rows

    # Pad the flat array only when needed to form the lane-dense (rows, cols) slab
    # (zeros: 0 AND 0 == False, sliced off afterwards).
    n_pad = rows * cols

    def to_slab(a):
        flat = a.reshape(-1)
        if n_pad != n:
            flat = jnp.pad(flat, (0, n_pad - n))
        return flat.reshape(rows, cols)

    x2 = to_slab(x)
    y2 = to_slab(y)

    if not use_grid:
        out = pl.pallas_call(
            kernel,
            out_shape=jax.ShapeDtypeStruct((rows, cols), out_dtype),
            in_specs=[
                pl.BlockSpec((rows, cols), lambda: (0, 0)),
                pl.BlockSpec((rows, cols), lambda: (0, 0)),
            ],
            out_specs=pl.BlockSpec((rows, cols), lambda: (0, 0)),
        )(x2, y2)
    else:
        grid = (pl.cdiv(rows, block_rows),)
        out = pl.pallas_call(
            kernel,
            out_shape=jax.ShapeDtypeStruct((rows, cols), out_dtype),
            grid=grid,
            in_specs=[
                pl.BlockSpec((block_rows, cols), lambda i: (i, 0)),
                pl.BlockSpec((block_rows, cols), lambda i: (i, 0)),
            ],
            out_specs=pl.BlockSpec((block_rows, cols), lambda i: (i, 0)),
            compiler_params=pltpu.CompilerParams(
                dimension_semantics=("parallel",),
                # 2 inputs x 2 bufs x 4 MiB + double-buffered 1-byte output ~= 18 MiB.
                # 32 MiB scoped VMEM is safe on v5e/v6e (128 MiB phys) and v7x (64 MiB).
                vmem_limit_bytes=32 << 20,
            ),
        )(x2, y2)

    out_flat = out.reshape(-1)
    if n_pad != n:
        out_flat = out_flat[:n]
    result = out_flat.reshape(orig_shape)
    if out_dtype != jnp.bool_:
        result = result.astype(jnp.bool_)  # fallback path only; stays a single fused pass
    return result


# Single jitted entry point: reshapes / (optional) pad + slice are compiled together
# with the Pallas custom call instead of being separate eagerly-dispatched ops.
logical_and_pallas = jax.jit(_logical_and_impl)


if __name__ == "__main__":
    key = jax.random.PRNGKey(0)
    k0, k1, k2, k3 = jax.random.split(key, 4)

    # Primary example (matches the module's elementwise binary-op usage): NCHW pair.
    shape = (2, 4, 16, 16)
    x = jax.random.randint(k0, shape, minval=0, maxval=3).astype(jnp.float32)
    y = jax.random.randint(k1, shape, minval=0, maxval=3).astype(jnp.float32)

    out = jax.block_until_ready(logical_and_pallas(x, y))
    ref = jnp.logical_and(x != 0, y != 0)
    assert out.shape == shape
    assert out.dtype == jnp.bool_
    assert bool(jnp.array_equal(out, ref))

    # Small non-128-divisible size exercises the pad-and-slice path.
    shape2 = (3, 5, 7)
    a = jax.random.randint(k2, shape2, minval=-1, maxval=2).astype(jnp.int32)
    b = jax.random.randint(k3, shape2, minval=-1, maxval=2).astype(jnp.int32)
    out2 = jax.block_until_ready(logical_and_pallas(a, b))
    ref2 = jnp.logical_and(a != 0, b != 0)
    assert out2.shape == shape2
    assert out2.dtype == jnp.bool_
    assert bool(jnp.array_equal(out2, ref2))

    print("KERNEL_OK")
</pallas_src>

<mosaic_0001>
module attributes {stable_mosaic.version = 11 : i64} {
  func.func @_logical_and_bool_kernel(%arg0: memref<1x2048xf32, #tpu.memory_space<vmem>>, %arg1: memref<1x2048xf32, #tpu.memory_space<vmem>>, %arg2: memref<1x2048xi32, #tpu.memory_space<vmem>>) attributes {dimension_semantics = [], scalar_prefetch = 0 : i64, scratch_operands = 0 : i64, tpu.core_type = #tpu.core_type<tc>} {
    %c0 = arith.constant 0 : index
    %c0_0 = arith.constant 0 : index
    %0 = vector.load %arg0[%c0, %c0_0] : memref<1x2048xf32, #tpu.memory_space<vmem>>, vector<1x2048xf32>
    %cst = arith.constant 0.000000e+00 : f32
    %1 = vector.broadcast %cst : f32 to vector<1x2048xf32>
    %2 = arith.cmpf one, %0, %1 : vector<1x2048xf32>
    %c0_1 = arith.constant 0 : index
    %c0_2 = arith.constant 0 : index
    %3 = vector.load %arg1[%c0_1, %c0_2] : memref<1x2048xf32, #tpu.memory_space<vmem>>, vector<1x2048xf32>
    %cst_3 = arith.constant 0.000000e+00 : f32
    %4 = vector.broadcast %cst_3 : f32 to vector<1x2048xf32>
    %5 = arith.cmpf one, %3, %4 : vector<1x2048xf32>
    %6 = arith.andi %2, %5 : vector<1x2048xi1>
    %c0_4 = arith.constant 0 : index
    %c0_5 = arith.constant 0 : index
    %7 = vector.load %arg2[%c0_4, %c0_5] : memref<1x2048xi32, #tpu.memory_space<vmem>>, vector<1x2048xi32>
    %8 = arith.extui %6 : vector<1x2048xi1> to vector<1x2048xi32>
    %cst_6 = arith.constant dense<0> : vector<1x2048xi32>
    %9 = arith.cmpi ne, %7, %cst_6 : vector<1x2048xi32>
    tpu.vector_store %arg2[%c0_4, %c0_5], %8 {strides = array<i32>} : memref<1x2048xi32, #tpu.memory_space<vmem>>, vector<1x2048xi32>,
    return
  }
}

</mosaic_0001>

<bundles_post_ra>
// kernel: _logical_and_impl.1
= control target key start
LH: loop header
LB: loop body
LE: loop exit
PB: predicated region body
PF: predicated region fallthrough
CT: control target
= control target key end

     0   :  { %v30_v4 = vmov 0   ;;  %s64_s0 = inlined_call_operand.vmem [shape: f32[1,2048], index: 0, kind: input, shape index: {}]   ;;  %s65_s1 = inlined_call_operand.vmem [shape: f32[1,2048], index: 1, kind: input, shape index: {}]   ;;  %s66_s2 = inlined_call_operand.vmem [shape: s32[1,2048], index: 2, kind: output, shape index: {}]  }
   0x1   :  { %v11_v0 = vld [vmem:[%s64_s0] sm:$0xff]  ;;  %v12_v2 = vld [vmem:[%s64_s0 + $0x8] sm:$0xff] }
   0x2   :  { %v15_v1 = vld [vmem:[%s65_s1] sm:$0xff]  ;;  %vm13_vm0 = vcmp.ne.f32.partialorder %v11_v0, 0.0  ;;  %vm14_vm2 = vcmp.ne.f32.partialorder %v12_v2, 0.0  ;;  %v16_v3 = vld [vmem:[%s65_s1 + $0x8] sm:$0xff] }
   0x3   :  { %vm17_vm1 = vcmp.ne.f32.partialorder %v15_v1, 0.0  ;;  %vm18_vm4 = vcmp.ne.f32.partialorder %v16_v3, 0.0 }
   0x4   :  { %vm19_vm3 = vmand %vm13_vm0, %vm17_vm1 }
   0x5   :  { %v21_v5 = vsel %vm19_vm3, 1, %v30_v4  ;;  %vm20_vm5 = vmand %vm14_vm2, %vm18_vm4 }
   0x6   :  { %23 = vst [vmem:[%s66_s2] sm:$0xff] %v21_v5  ;;  %v22_v6 = vsel %vm20_vm5, 1, %v30_v4 }
   0x7   :  { %24 = vst [vmem:[%s66_s2 + $0x8] sm:$0xff] %v22_v6 }

</bundles_post_ra>
